<compile_context>
chip_gen: v6e
topology: v6e:2x2x1
jax: 0.10.0
libtpu: 0.0.40
codegen_flags: <defaults>
</compile_context>

<pallas_src>
import functools

import jax
import jax.numpy as jnp
from jax import lax
from jax.experimental import pallas as pl
from jax.experimental.pallas import tpu as pltpu


def _round_up(x, m):
    return (x + m - 1) // m * m


def _cdiv(a, b):
    return (a + b - 1) // b


def _device_kind():
    try:
        return jax.devices()[0].device_kind.lower()
    except Exception:
        return ""


def _vmem_capacity_bytes(kind):
    try:
        return int(pltpu.get_tpu_info().vmem_capacity_bytes)
    except Exception:
        pass
    return (64 if "v7" in kind else 128) * 1024 * 1024


def _mxu_step(kind):
    # v6e/v7x MXUs are 256x256; v5e is 128x128.
    return 128 if "v5" in kind else 256


def _default_block_m(kind):
    if "v7" in kind:
        return 512          # 64 MiB VMEM/TC -> smaller token tile
    if "v6" in kind:
        return 768          # weight-stream roofline ~640 flop/byte
    return 256              # v5e / unknown


def _default_block_h(kind):
    return 256 if "v7" in kind else 512


def _resolve_block_h(H, block_h, step):
    """Return (th, H_pad): hidden tile size and zero-padded hidden size."""
    if H <= block_h:
        return H, H                      # one full-H tile (block == full dims)
    th = max(step, (block_h // step) * step)
    return th, _round_up(H, th)          # pad H instead of full-H fallback


def pack_ffn_weights(w1, w2, w3, *, block_h=None):
    """One-time (load-time) packing of the FFN weights for the kernel.

    w1, w2 : (H, E)  fc1 / fc2 weights in PyTorch layout (out_features, in_features)
    w3     : (E, H)  fc3 weight in PyTorch layout

    Returns (w12_t, w3_t, th):
      w12_t : (E, 2*H_pad) -- hidden block k (columns [k*2th, (k+1)*2th)) holds
              [gate tile k | up tile k], pre-transposed so both kernel matmuls
              are plain NN form (no per-step XLU transpose of weight tiles).
      w3_t  : (H_pad, E)   -- fc3 weight transposed (zero-padded in H if needed).
      th    : resolved hidden tile; pass as `hidden_block` to feed_forward.
    """
    H, E = w1.shape
    assert w2.shape == (H, E) and w3.shape == (E, H)
    kind = _device_kind()
    if block_h is None:
        block_h = _default_block_h(kind)
    th, H_pad = _resolve_block_h(H, block_h, _mxu_step(kind))
    if H_pad != H:                       # zero-pad awkward hidden sizes
        pad = H_pad - H
        w1 = jnp.pad(w1, ((0, pad), (0, 0)))
        w2 = jnp.pad(w2, ((0, pad), (0, 0)))
        w3 = jnp.pad(w3, ((0, 0), (0, pad)))
    hb = H_pad // th
    w12 = jnp.concatenate(
        [w1.reshape(hb, th, E), w2.reshape(hb, th, E)], axis=1)   # (hb, 2th, E)
    w12_t = w12.reshape(2 * H_pad, E).T                           # (E, 2*H_pad)
    w3_t = w3.T                                                   # (H_pad, E)
    return w12_t, w3_t, th


def _ffn_kernel(x_ref, w12_ref, w3_ref, o_ref, acc_ref):
    # x_ref   : (tm, E)        token tile
    # w12_ref : (E, 2*th)      packed [gate | up] weight tile (hidden tile k)
    # w3_ref  : (th, E)        down-projection weight tile (hidden tile k)
    # o_ref   : (tm, E)        output tile (same block across the k axis)
    # acc_ref : (tm, E) f32    VMEM accumulator
    k = pl.program_id(1)

    @pl.when(k == 0)
    def _():
        acc_ref[...] = jnp.zeros_like(acc_ref)

    th = w3_ref.shape[0]

    # Fused gate + up projection, NN form (contract x's E with w12's E rows).
    h = lax.dot_general(
        x_ref[...], w12_ref[...], (((1,), (0,)), ((), ())),
        preferred_element_type=jnp.float32)            # (tm, 2*th) f32
    h1 = h[:, :th]                                     # gate projection
    h2 = h[:, th:]                                     # up projection

    # SiLU gate in f32 (EUP sigmoid + VPU multiply).
    gated = (h1 * jax.nn.sigmoid(h1)) * h2             # (tm, th) f32

    # Down projection for this hidden tile, NN form; accumulate in f32.
    acc_ref[...] += lax.dot_general(
        gated.astype(w3_ref.dtype), w3_ref[...], (((1,), (0,)), ((), ())),
        preferred_element_type=jnp.float32)            # (tm, E)

    @pl.when(k == pl.num_programs(1) - 1)
    def _():
        o_ref[...] = acc_ref[...].astype(o_ref.dtype)


@functools.partial(jax.jit, static_argnames=("hidden_block", "block_m"))
def feed_forward(x, w12_t, w3_t, *, hidden_block, block_m=None):
    """SwiGLU FFN: fc3( silu(fc1(x)) * fc2(x) ).

    x            : (B, S, E)
    w12_t, w3_t  : packed weights from pack_ffn_weights(...)
    hidden_block : resolved hidden tile th returned by pack_ffn_weights
    """
    B, S, E = x.shape
    H_pad, Ew = w3_t.shape
    th = int(hidden_block)
    # Layout-consistency checks (avoid silent gate/up interleave mismatch).
    assert Ew == E and w12_t.shape == (E, 2 * H_pad)
    assert H_pad % th == 0
    assert th == H_pad or (2 * th) % 128 == 0
    n_h = H_pad // th

    kind = _device_kind()
    if block_m is None:
        block_m = _default_block_m(kind)

    # Token tiling: sublane-aligned; keep >= 1 token tile per TensorCore (v7x).
    M = B * S
    sub = 8 * max(1, 4 // x.dtype.itemsize)          # 8 for f32, 16 for bf16
    tm = _round_up(min(block_m, _round_up(M, sub)), sub)
    n_cores = 2 if "v7" in kind else 1
    if n_cores > 1 and M >= n_cores * sub:
        tm = min(tm, _round_up(_cdiv(M, n_cores), sub))
    M_pad = _round_up(M, tm)
    n_m = M_pad // tm

    x2d = x.reshape(M, E)
    if M_pad != M:                                   # copy only when ragged
        x2d = jnp.pad(x2d, ((0, M_pad - M), (0, 0)))

    # VMEM budget from actual tile footprint, capped by PHYSICAL VMEM.
    xb = x.dtype.itemsize
    wb = w12_t.dtype.itemsize
    w3b = w3_t.dtype.itemsize
    tile_bytes = (
        2 * tm * E * xb            # x tile (double-buffered)
        + 2 * tm * E * xb          # out tile (double-buffered)
        + 2 * E * 2 * th * wb      # packed gate/up weight tile (double-buffered)
        + 2 * th * E * w3b         # down-projection weight tile (double-buffered)
        + tm * E * 4               # f32 accumulator
        + tm * 3 * th * 4          # h / gated f32 intermediates
    )
    vmem_cap = _vmem_capacity_bytes(kind)
    vmem_limit = int(min(0.9 * vmem_cap,
                         max(32 * 1024 * 1024, 1.15 * tile_bytes)))

    # Weights are re-streamed once per token tile -> count them n_m times.
    cost = pl.CostEstimate(
        flops=6 * M_pad * E * H_pad,
        transcendentals=M_pad * H_pad,
        bytes_accessed=int(2 * M_pad * E * xb
                           + n_m * (2 * H_pad * E * wb + H_pad * E * w3b)),
    )

    out2d = pl.pallas_call(
        _ffn_kernel,
        out_shape=jax.ShapeDtypeStruct((M_pad, E), x.dtype),
        grid_spec=pltpu.PrefetchScalarGridSpec(
            num_scalar_prefetch=0,
            grid=(n_m, n_h),                                   # reduction axis last
            in_specs=[
                pl.BlockSpec((tm, E), lambda i, k: (i, 0)),        # x tile
                pl.BlockSpec((E, 2 * th), lambda i, k: (0, k)),    # packed w1/w2
                pl.BlockSpec((th, E), lambda i, k: (k, 0)),        # w3 (pre-transposed)
            ],
            out_specs=pl.BlockSpec((tm, E), lambda i, k: (i, 0)),
            scratch_shapes=[pltpu.VMEM((tm, E), jnp.float32)],
        ),
        compiler_params=pltpu.CompilerParams(
            dimension_semantics=("parallel", "arbitrary"),
            vmem_limit_bytes=vmem_limit),
        cost_estimate=cost,
    )(x2d, w12_t, w3_t)

    return out2d[:M].reshape(B, S, E)


def feed_forward_ref(x, w1, w2, w3):
    """Pure-JAX reference matching the PyTorch module semantics."""
    h1 = x @ w1.T
    h2 = x @ w2.T
    return (jax.nn.silu(h1) * h2) @ w3.T


if __name__ == "__main__":
    def init(key, B, S, E, H, dtype):
        kx, k1, k2, k3 = jax.random.split(key, 4)
        x = jax.random.normal(kx, (B, S, E), dtype=jnp.float32)
        w1 = jax.random.normal(k1, (H, E), dtype=jnp.float32) * (E ** -0.5)
        w2 = jax.random.normal(k2, (H, E), dtype=jnp.float32) * (E ** -0.5)
        w3 = jax.random.normal(k3, (E, H), dtype=jnp.float32) * (H ** -0.5)
        return (x.astype(dtype), w1.astype(dtype),
                w2.astype(dtype), w3.astype(dtype))

    key = jax.random.PRNGKey(0)
    ka, kb, kc = jax.random.split(key, 3)

    # --- Config 1: small shapes consistent with the module (single tile). ---
    B, S, E, H = 2, 8, 32, 64
    x, w1, w2, w3 = init(ka, B, S, E, H, jnp.float32)
    w12_t, w3_t, th = pack_ffn_weights(w1, w2, w3)
    out = jax.block_until_ready(feed_forward(x, w12_t, w3_t, hidden_block=th))
    ref = feed_forward_ref(x, w1, w2, w3)
    assert out.shape == (B, S, E)
    assert jnp.allclose(out, ref, atol=2e-5, rtol=2e-5), "config1 mismatch"

    # --- Config 2: multi-tile grid, ragged M=200, awkward H=384 (padded). ---
    B2, S2, E2, H2 = 2, 100, 128, 384
    x2, w1b, w2b, w3b = init(kb, B2, S2, E2, H2, jnp.float32)
    w12b, w3tb, thb = pack_ffn_weights(w1b, w2b, w3b, block_h=256)
    out2 = jax.block_until_ready(
        feed_forward(x2, w12b, w3tb, hidden_block=thb, block_m=128))
    ref2 = feed_forward_ref(x2, w1b, w2b, w3b)
    assert out2.shape == (B2, S2, E2)
    assert jnp.allclose(out2, ref2, atol=5e-3, rtol=5e-3), "config2 mismatch"

    # --- Config 3: bfloat16 parameters/activations (fast MXU path). ---
    B3, S3, E3, H3 = 2, 100, 128, 512
    x3, w1c, w2c, w3c = init(kc, B3, S3, E3, H3, jnp.bfloat16)
    w12c, w3tc, thc = pack_ffn_weights(w1c, w2c, w3c, block_h=256)
    out3 = jax.block_until_ready(
        feed_forward(x3, w12c, w3tc, hidden_block=thc, block_m=128))
    ref3 = feed_forward_ref(x3.astype(jnp.float32), w1c.astype(jnp.float32),
                            w2c.astype(jnp.float32), w3c.astype(jnp.float32))
    assert out3.shape == (B3, S3, E3)
    assert jnp.allclose(out3.astype(jnp.float32), ref3,
                        atol=1e-1, rtol=1e-1), "config3 mismatch"

    print("KERNEL_OK")
</pallas_src>

<mosaic_0001>
module attributes {stable_mosaic.version = 11 : i64} {
  func.func @_ffn_kernel(%arg0: i32, %arg1: i32, %arg2: memref<16x32xf32, #tpu.memory_space<vmem>>, %arg3: memref<32x128xf32, #tpu.memory_space<vmem>>, %arg4: memref<64x32xf32, #tpu.memory_space<vmem>>, %arg5: memref<16x32xf32, #tpu.memory_space<vmem>>, %arg6: memref<16x32xf32, #tpu.memory_space<vmem>>) attributes {dimension_semantics = [#tpu.dimension_semantics<parallel>, #tpu.dimension_semantics<arbitrary>], iteration_bounds = array<i64: 1, 1>, scalar_prefetch = 0 : i64, scratch_operands = 1 : i64, tpu.core_type = #tpu.core_type<tc>, window_params = [{transform_indices = @transform_0, window_bounds = array<i64: 16, 32>}, {transform_indices = @transform_1, window_bounds = array<i64: 32, 128>}, {transform_indices = @transform_2, window_bounds = array<i64: 64, 32>}, {transform_indices = @transform_3, window_bounds = array<i64: 16, 32>}]} {
    %c0_i32 = arith.constant 0 : i32
    %0 = arith.cmpi eq, %arg1, %c0_i32 : i32
    %1 = arith.extui %0 : i1 to i32
    %c0_i32_0 = arith.constant 0 : i32
    %2 = arith.cmpi ne, %1, %c0_i32_0 : i32
    scf.if %2 {
      %cst_14 = arith.constant 0.000000e+00 : f32
      %23 = vector.broadcast %cst_14 : f32 to vector<16x32xf32>
      %c0_15 = arith.constant 0 : index
      %c0_16 = arith.constant 0 : index
      %24 = vector.load %arg6[%c0_15, %c0_16] : memref<16x32xf32, #tpu.memory_space<vmem>>, vector<16x32xf32>
      tpu.vector_store %arg6[%c0_15, %c0_16], %23 {strides = array<i32>} : memref<16x32xf32, #tpu.memory_space<vmem>>, vector<16x32xf32>,
    } else {
    }
    %c0 = arith.constant 0 : index
    %c0_1 = arith.constant 0 : index
    %3 = vector.load %arg2[%c0, %c0_1] : memref<16x32xf32, #tpu.memory_space<vmem>>, vector<16x32xf32>
    %c0_2 = arith.constant 0 : index
    %c0_3 = arith.constant 0 : index
    %4 = vector.load %arg3[%c0_2, %c0_3] : memref<32x128xf32, #tpu.memory_space<vmem>>, vector<32x128xf32>
    %cst = arith.constant dense<0.000000e+00> : vector<16x128xf32>
    %5 = tpu.matmul %3, %4, %cst {dimension_numbers = #tpu.dot_dimension_numbers<[1], [0], [0], [1], [0, 0, 1, 1], [], []>} : vector<16x32xf32>, vector<32x128xf32>, vector<16x128xf32> -> vector<16x128xf32>
    %6 = vector.extract_strided_slice %5 {offsets = [0, 0], sizes = [16, 64], strides = [1, 1]} : vector<16x128xf32> to vector<16x64xf32>
    %7 = vector.extract_strided_slice %5 {offsets = [0, 64], sizes = [16, 64], strides = [1, 1]} : vector<16x128xf32> to vector<16x64xf32>
    %8 = arith.negf %6 : vector<16x64xf32>
    %9 = math.exp %8 : vector<16x64xf32>
    %cst_4 = arith.constant 1.000000e+00 : f32
    %10 = vector.broadcast %cst_4 : f32 to vector<16x64xf32>
    %11 = arith.addf %10, %9 : vector<16x64xf32>
    %12 = arith.divf %10, %11 : vector<16x64xf32>
    %13 = arith.mulf %6, %12 : vector<16x64xf32>
    %14 = arith.mulf %13, %7 : vector<16x64xf32>
    %c0_5 = arith.constant 0 : index
    %c0_6 = arith.constant 0 : index
    %15 = vector.load %arg6[%c0_5, %c0_6] : memref<16x32xf32, #tpu.memory_space<vmem>>, vector<16x32xf32>
    %c0_7 = arith.constant 0 : index
    %c0_8 = arith.constant 0 : index
    %16 = vector.load %arg4[%c0_7, %c0_8] : memref<64x32xf32, #tpu.memory_space<vmem>>, vector<64x32xf32>
    %cst_9 = arith.constant dense<0.000000e+00> : vector<16x32xf32>
    %17 = tpu.matmul %14, %16, %cst_9 {dimension_numbers = #tpu.dot_dimension_numbers<[1], [0], [0], [1], [0, 0, 1, 1], [], []>} : vector<16x64xf32>, vector<64x32xf32>, vector<16x32xf32> -> vector<16x32xf32>
    %18 = arith.addf %15, %17 : vector<16x32xf32>
    %c0_10 = arith.constant 0 : index
    %c0_11 = arith.constant 0 : index
    %19 = vector.load %arg6[%c0_10, %c0_11] : memref<16x32xf32, #tpu.memory_space<vmem>>, vector<16x32xf32>
    tpu.vector_store %arg6[%c0_10, %c0_11], %18 {strides = array<i32>} : memref<16x32xf32, #tpu.memory_space<vmem>>, vector<16x32xf32>,
    %c0_i32_12 = arith.constant 0 : i32
    %20 = arith.cmpi eq, %arg1, %c0_i32_12 : i32
    %21 = arith.extui %20 : i1 to i32
    %c0_i32_13 = arith.constant 0 : i32
    %22 = arith.cmpi ne, %21, %c0_i32_13 : i32
    scf.if %22 {
      %c0_14 = arith.constant 0 : index
      %c0_15 = arith.constant 0 : index
      %23 = vector.load %arg6[%c0_14, %c0_15] : memref<16x32xf32, #tpu.memory_space<vmem>>, vector<16x32xf32>
      %c0_16 = arith.constant 0 : index
      %c0_17 = arith.constant 0 : index
      %24 = vector.load %arg5[%c0_16, %c0_17] : memref<16x32xf32, #tpu.memory_space<vmem>>, vector<16x32xf32>
      tpu.vector_store %arg5[%c0_16, %c0_17], %23 {strides = array<i32>} : memref<16x32xf32, #tpu.memory_space<vmem>>, vector<16x32xf32>,
    } else {
    }
    return
  }
  func.func @transform_0(%arg0: i32, %arg1: i32) -> (i32, i32) {
    %c0_i32 = arith.constant 0 : i32
    %c0_i32_0 = arith.constant 0 : i32
    return %arg0, %c0_i32 : i32, i32
  }
  func.func @transform_1(%arg0: i32, %arg1: i32) -> (i32, i32) {
    %c0_i32 = arith.constant 0 : i32
    %c0_i32_0 = arith.constant 0 : i32
    return %c0_i32, %arg1 : i32, i32
  }
  func.func @transform_2(%arg0: i32, %arg1: i32) -> (i32, i32) {
    %c0_i32 = arith.constant 0 : i32
    %c0_i32_0 = arith.constant 0 : i32
    return %arg1, %c0_i32 : i32, i32
  }
  func.func @transform_3(%arg0: i32, %arg1: i32) -> (i32, i32) {
    %c0_i32 = arith.constant 0 : i32
    %c0_i32_0 = arith.constant 0 : i32
    return %arg0, %c0_i32 : i32, i32
  }
}

</mosaic_0001>

<bundles_post_ra>
// kernel: feed_forward.1
= control target key start
LH: loop header
LB: loop body
LE: loop exit
PB: predicated region body
PF: predicated region fallthrough
CT: control target
= control target key end

     0   :  { %vm19_vm0 = vcmask 261120   ;;  %s418_s0 = inlined_call_operand.vmem [shape: f32[16,32], index: 0, kind: input, shape index: {}]   ;;  %s419_s1 = inlined_call_operand.vmem [shape: f32[32,128], index: 1, kind: input, shape index: {}]   ;;  %s420_s2 = inlined_call_operand.vmem [shape: f32[64,32], index: 2, kind: input, shape index: {}]   ;;  %s421_s3 = inlined_call_operand.hbm [shape: f32[16,32], index: 3, kind: output, shape index: {}]  }
   0x1   :  { %v27_v0 = vld [vmem:[%s419_s1 + $0x18] sm:$0xff]  ;;  %v26_v1 = vld [vmem:[%s419_s1 + $0x10] sm:$0xff]  ;;  %v22_v2 = vld [vmem:[%s418_s0] sm:$0xff] }
   0x2   :  { %275 = vmatprep.subr.mxu0 %v27_v0  ;;  %v25_v3 = vld [vmem:[%s419_s1 + $0x8] sm:$0xff]  ;;  %283 = vmatprep.mubr.msk.f32.mxu0 %vm19_vm0, %v22_v2 }
   0x3   :  { %276 = vmatpush3.msra.mxu0 %v27_v0 }
   0x4   :  { %8 = vsyncpa [#allocation4], 0  ;;  %277 = vmatprep.subr.mxu0 %v26_v1  ;;  %v24_v4 = vld [vmem:[%s419_s1] sm:$0xff]  ;;  %v23_v5 = vld [vmem:[%s418_s0 + $0x8] sm:$0xff]  ;;  %v340_v14 = vmov 0.0   ;;  %s341_s11 = smov 64  }
   0x5   :  { %278 = vmatpush3.msra.mxu0 %v26_v1  ;;  %v143_v6 = vld [vmem:[%s420_s2 + $0x38] sm:$0xff]  ;;  %v142_v7 = vld [vmem:[%s420_s2 + $0x30] sm:$0xff]  ;;  %v141_v8 = vld [vmem:[%s420_s2 + $0x28] sm:$0xff]  ;;  %21 = vst.msk [vmem:[#allocation2 + $0x8] sm:$0xff] %vm19_vm0, %v340_v14  ;;  %vm144_vm1 = vcmask 523264  }
   0x6   :  { %279 = vmatprep.subr.mxu0 %v25_v3  ;;  %286 = vmatprep.subr.mxu1 %v143_v6  ;;  %v140_v9 = vld [vmem:[%s420_s2 + $0x20] sm:$0xff]  ;;  %v139_v10 = vld [vmem:[%s420_s2 + $0x18] sm:$0xff]  ;;  %v138_v11 = vld [vmem:[%s420_s2 + $0x10] sm:$0xff]  ;;  %20 = vst.msk [vmem:[#allocation2] sm:$0xff] %vm19_vm0, %v340_v14 }
   0x7   :  { %280 = vmatpush3.msra.mxu0 %v25_v3  ;;  %287 = vmatpush3.msra.mxu1 %v143_v6  ;;  %v137_v12 = vld [vmem:[%s420_s2 + $0x8] sm:$0xff]  ;;  %v136_v13 = vld [vmem:[%s420_s2] sm:$0xff]  ;;  %s342_s2 = smov [#allocation3]  }
   0x8   :  { %281 = vmatprep.subr.mxu0 %v24_v4  ;;  %288 = vmatprep.subr.mxu1 %v142_v7  ;;  %s242_s12 = sshll.u32 %s342_s2, 4  ;;  %s243_s12 = int_to_ptr.vmem [resolvable:$true] %s242_s12 }
   0x9   :  { %282 = vmatpush3.msra.mxu0 %v24_v4  ;;  %289 = vmatpush3.msra.mxu1 %v142_v7  ;;  %s318_s13 = scalar_lea.vmem %s243_s12, 256  ;;  %p323_p1 = scmp.lt.s32.totalorder %s243_s12, %s243_s12 }
   0xa   :  { %284 = vmatmul.mubr.msk.f32.vlgmr.msra.gmra.mxu0 %vm19_vm0, %v23_v5  ;;  %290 = vmatprep.subr.mxu1 %v141_v8  ;;  %p319_p0 = scmp.ne.s32.totalorder %s243_s12, %s318_s13  ;;  %p324_p2 = scmp.lt.s32.totalorder %s318_s13, %s318_s13 }
   0xb   :  { %291 = vmatpush3.msra.mxu1 %v141_v8 }
   0xc   :  { %292 = vmatprep.subr.mxu1 %v140_v9  ;;  %v135_v31 = vld [vmem:[#allocation2 + $0x8] sm:$0xff]  ;;  %p325_p3 = por %p324_p2, %p323_p1 }
   0xd   :  { %293 = vmatpush3.msra.mxu1 %v140_v9  ;;  %v134_v33 = vld [vmem:[#allocation2] sm:$0xff] }
   0xe   :  { %294 = vmatprep.subr.mxu1 %v139_v10  ;;  %p326_p4 = pnand %p325_p3, %p319_p0 }
   0xf   :  { %295 = vmatpush3.msra.mxu1 %v139_v10 }
  0x10   :  { %296 = vmatprep.subr.mxu1 %v138_v11 }
  0x11   :  { %297 = vmatpush3.msra.mxu1 %v138_v11 }
  0x12   :  { %298 = vmatprep.subr.mxu1 %v137_v12 }
  0x13   :  { %299 = vmatpush3.msra.mxu1 %v137_v12 }
  0x14   :  { %300 = vmatprep.subr.mxu1 %v136_v13 }
  0x15   :  { %301 = vmatpush3.msra.mxu1 %v136_v13 }
  0xca   :  { %v285_v15 = vpop.f32.mrf.mxu0 }
  0xcb   :  { %v256_v18 = vmul.f32 -1.442695, %v285_v15 }
  0xcc   :  { %v101_v16 = vpop.f32.mrf.mxu0 }
  0xcd   :  { %126 = vrot.lane.b32.xlu0 %v101_v16, %s341_s11  ;;  %v255_v17 = vmul.f32 -1.442695, %v101_v16 }
  0xcf   :  { %310 = vpow2.f32 %v255_v17 }
  0xd0   :  { %312 = vpow2.f32 %v256_v18 }
  0xd1   :  { %128 = vrot.lane.b32.xlu0 %v285_v15, %s341_s11 }
  0xdc   :  { %v311_v19 = vpop.eup %310 }
  0xdd   :  { %v116_v20 = vadd.f32 1.0, %v311_v19  ;;  %v313_v21 = vpop.eup %312 }
  0xde   :  { %v117_v22 = vadd.f32 1.0, %v313_v21 }
  0xdf   :  { %314 = vrcp.f32 %v116_v20 }
  0xe0   :  { %316 = vrcp.f32 %v117_v22 }
  0xec   :  { %v315_v23 = vpop.eup %314 }
  0xed   :  { %v122_v24 = vmul.f32 %v315_v23, %v101_v16  ;;  %v317_v25 = vpop.eup %316 }
  0xee   :  { %v123_v28 = vmul.f32 %v317_v25, %v285_v15 }
 0x13f   :  { %v127_v26 = vpop.permute.xlu0 %126 }
 0x140   :  { %v132_v27 = vmul.f32 %v127_v26, %v122_v24 }
 0x142   :  { %302 = vmatprep.mubr.msk.f32.mxu1 %vm144_vm1, %v132_v27 }
 0x143   :  { %v129_v29 = vpop.permute.xlu0 %128 }
 0x144   :  { %v133_v30 = vmul.f32 %v129_v29, %v123_v28 }
 0x146   :  { %303 = vmatmul.mubr.msk.f32.vlgmr.msra.gmra.mxu1 %vm144_vm1, %v133_v30 }
 0x206   :  { %v304_v32 = vpop.f32.mrf.mxu1 }
 0x207   :  { %v227_v34 = vadd.f32 %v304_v32, %v135_v31 }
 0x208   :  { %v217_v35 = vpop.f32.mrf.mxu1 }
 0x209   :  { %229 = vst.msk [vmem:[#allocation2 + $0x8] sm:$0xff] %vm19_vm0, %v227_v34  ;;  %v226_v36 = vadd.f32 %v217_v35, %v134_v33 }
 0x20b   :  { %228 = vst.msk [vmem:[#allocation2] sm:$0xff] %vm19_vm0, %v226_v36 }
 0x210   :  { %v234_v37 = vld [vmem:[#allocation2 + $0x8] sm:$0xff] }
 0x211   :  { %236 = vst.msk [vmem:[#allocation3 + $0x8] sm:$0xff] %vm19_vm0, %v234_v37 }
 0x212   :  { %v233_v38 = vld [vmem:[#allocation2] sm:$0xff] }
 0x213   :  { %235 = vst.msk [vmem:[#allocation3] sm:$0xff] %vm19_vm0, %v233_v38 }
 0x214   :  { %329 = shalt.err (!%p326_p4)
}
 0x215   :  { %s343_s14 = smov 128   ;;  %s344_s15 = smov 8  }
 0x216   :  { %248 = dma.vmem_to_hbm [thread:$0]  %s243_s12, 256, %s421_s3, [#allocation4], %s343_s14, %s343_s14, %s344_s15  }
 0x217   :  { %338 = dma.done.wait [#allocation4], 256  }
 0x218   :  { %339 = vsyncadd [#allocation4], 4294967040 }
 0x219   :  { %252 = vsyncpa [#allocation4], 1 }

</bundles_post_ra>
